<compile_context>
chip_gen: v7x
topology: tpu7x:2x2x1
jax: 0.10.0
libtpu: 0.0.40
codegen_flags: <defaults>
</compile_context>

<pallas_src>
import jax
import jax.numpy as jnp
from jax.experimental import pallas as pl
from jax.experimental.pallas import tpu as pltpu

INPUT_SIZE = 4
OUTPUT_SIZE = 3

_PACK = 128 // INPUT_SIZE            # 32 batch rows packed per 128-lane vector row
_IN_W = _PACK * INPUT_SIZE           # 128 packed-input lanes (exactly one lane tile)
_OUT_W = _PACK * OUTPUT_SIZE         # 96 packed-output lanes

_ROW_GRAN = 8                        # f32 sublane granularity (packed rows)
_MIN_TILE_B = _PACK * _ROW_GRAN      # 256 batch rows
_MAX_TILE_B = 131072                 # 4096 packed rows ~= 8 MiB double-buffered VMEM


def _round_up(x, m):
    return ((x + m - 1) // m) * m


def _linear_kernel(m_ref, b_ref, x_ref, o_ref):
    """One batch tile:  o = x_packed @ M + bias_packed  (all lane-dense).

    m_ref : (128, 96) VMEM  block-diagonal weights:
                            M[4*b + k, 3*c + j] = W[k, j] if b == c else 0.
    b_ref : (1, 96)   VMEM  bias tiled 32x: b_ref[0, 3*c + j] = bias[j].
    x_ref : (TR, 128) VMEM  lane l of row r holds x[32*r + l//4, l % 4]
                            (native row-major (B, 4) data, just re-viewed).
    o_ref : (TR, 96)  VMEM  lane m of row r holds y[32*r + m//3, m % 3],
                            i.e. exactly the row-major (B, 3) output.
    """
    y = jnp.dot(x_ref[...].astype(jnp.float32), m_ref[...],
                preferred_element_type=jnp.float32)       # MXU: contraction + de-interleave
    o_ref[...] = (y + b_ref[...]).astype(o_ref.dtype)     # single full-block store


def ann_linear(x, weight, bias, *, tile_b=None):
    """x: (B, 4), weight: (4, 3), bias: (3,) -> (B, 3);  y = x @ weight + bias.

    Equivalent to PyTorch's x @ W_pt.T + b (weight here is W_pt transposed).
    Call under jax.jit so the packing reshapes stay metadata-only.
    """
    if x.ndim != 2 or x.shape[1] != INPUT_SIZE:
        raise ValueError(f"expected x of shape (B, {INPUT_SIZE}), got {x.shape}")
    B = x.shape[0]

    # Pad batch to a multiple of 32 (free-reshape requirement); small batches
    # to 256 so every block has >= 8 sublane rows.  Waste is < 32 rows for
    # large B -- partial tiles are handled by the grid, not by padding.
    b_pad = max(_round_up(max(B, 1), _PACK), _MIN_TILE_B)
    if b_pad != B:
        # TODO(synk): for B % 32 != 0 this pad (and the final slice) costs one
        # extra HBM pass; handle the <32-row tail outside the kernel if needed.
        x = jnp.pad(x, ((0, b_pad - B), (0, 0)))
    num_rows = b_pad // _PACK

    # Tile selection (batch rows): multiple of 256 (= 8 f32 sublanes of 32
    # packed rows), capped at _MAX_TILE_B; default aims for >= 2 grid steps so
    # both v7x TensorCores participate.
    if tile_b is None:
        target_rows = pl.cdiv(num_rows, 2)
        tile_r = min(_MAX_TILE_B // _PACK,
                     max(_ROW_GRAN, _round_up(target_rows, _ROW_GRAN)))
    else:
        tile_b = min(_MAX_TILE_B, max(_MIN_TILE_B, _round_up(int(tile_b), _MIN_TILE_B)))
        tile_r = tile_b // _PACK
    tile_r = min(tile_r, num_rows)          # if clamped it equals the full extent
    num_tiles = pl.cdiv(num_rows, tile_r)

    # Free layout view of x + tiny packed parameters (a few KiB, built once).
    x_packed = x.reshape(num_rows, _IN_W)                               # (B/32, 128)
    eye = jnp.eye(_PACK, dtype=jnp.float32)
    w32 = weight.astype(jnp.float32)
    m_mat = (eye[:, None, :, None] * w32[None, :, None, :]).reshape(_IN_W, _OUT_W)
    bias_packed = jnp.tile(bias.astype(jnp.float32), _PACK)[None, :]    # (1, 96)

    y_packed = pl.pallas_call(
        _linear_kernel,
        out_shape=jax.ShapeDtypeStruct((num_rows, _OUT_W), x.dtype),
        grid=(num_tiles,),
        in_specs=[
            pl.BlockSpec((_IN_W, _OUT_W), lambda i: (0, 0)),   # weights (resident)
            pl.BlockSpec((1, _OUT_W), lambda i: (0, 0)),       # bias    (resident)
            pl.BlockSpec((tile_r, _IN_W), lambda i: (i, 0)),   # x tile
        ],
        out_specs=pl.BlockSpec((tile_r, _OUT_W), lambda i: (i, 0)),
        compiler_params=pltpu.CompilerParams(
            dimension_semantics=("parallel",),                 # independent batch tiles
        ),
    )(m_mat, bias_packed, x_packed)

    y = y_packed.reshape(b_pad, OUTPUT_SIZE)                   # free view -> (B_pad, 3)
    return y if b_pad == B else y[:B]


def init_params(key):
    # Deterministic init mimicking nn.Linear's default: U(-1/sqrt(in), 1/sqrt(in)).
    kw, kb = jax.random.split(key)
    bound = 1.0 / (INPUT_SIZE ** 0.5)
    # stored as (in, out) == PyTorch weight (out, in) transposed
    weight = jax.random.uniform(kw, (INPUT_SIZE, OUTPUT_SIZE), jnp.float32, -bound, bound)
    bias = jax.random.uniform(kb, (OUTPUT_SIZE,), jnp.float32, -bound, bound)
    return weight, bias


def _reference(x, weight, bias):
    # f32-exact reference (forced HIGHEST so it does not itself use bf16 passes).
    return jnp.einsum("bi,io->bo", x, weight,
                      precision=jax.lax.Precision.HIGHEST) + bias


if __name__ == "__main__":
    key = jax.random.PRNGKey(0)
    kp, kx1, kx2 = jax.random.split(key, 3)
    weight, bias = init_params(kp)

    linear = jax.jit(ann_linear)
    linear_tiled = jax.jit(ann_linear, static_argnames=("tile_b",))

    # Tolerance covers the possibility of bf16 MXU passes for f32 operands at
    # default matmul precision (reference is computed at HIGHEST precision);
    # layout/indexing bugs would produce O(1) errors and still be caught.
    tol = dict(atol=2e-2, rtol=2e-2)

    # Small batch (exercises the pad-to-256 + slice path, single grid step).
    x1 = jax.random.normal(kx1, (8, INPUT_SIZE), jnp.float32)
    y1 = linear(x1, weight, bias)
    jax.block_until_ready(y1)
    assert y1.shape == (8, OUTPUT_SIZE)
    assert jnp.allclose(y1, _reference(x1, weight, bias), **tol)

    # Larger batch with an explicit small tile to exercise the multi-step,
    # double-buffered, "parallel" grid path (4096 rows / 512-row tiles = 8 steps).
    x2 = jax.random.normal(kx2, (4096, INPUT_SIZE), jnp.float32)
    y2 = linear_tiled(x2, weight, bias, tile_b=512)
    jax.block_until_ready(y2)
    assert y2.shape == (4096, OUTPUT_SIZE)
    assert jnp.allclose(y2, _reference(x2, weight, bias), **tol)

    print("KERNEL_OK")
</pallas_src>

<mosaic_0001>
module attributes {stable_mosaic.version = 11 : i64} {
  func.func @_linear_kernel(%arg0: i32, %arg1: memref<128x96xf32, #tpu.memory_space<vmem>>, %arg2: memref<1x96xf32, #tpu.memory_space<vmem>>, %arg3: memref<8x128xf32, #tpu.memory_space<vmem>>, %arg4: memref<8x96xf32, #tpu.memory_space<vmem>>) attributes {dimension_semantics = [#tpu.dimension_semantics<parallel>], iteration_bounds = array<i64: 1>, scalar_prefetch = 0 : i64, scratch_operands = 0 : i64, tpu.core_type = #tpu.core_type<tc>, window_params = [{pipeline_mode = #tpu.pipeline_mode<synchronous>, transform_indices = @transform_0, window_bounds = array<i64: 128, 96>}, {pipeline_mode = #tpu.pipeline_mode<synchronous>, transform_indices = @transform_1, window_bounds = array<i64: 1, 96>}, {transform_indices = @transform_2, window_bounds = array<i64: 8, 128>}, {transform_indices = @transform_3, window_bounds = array<i64: 8, 96>}]} {
    %c0 = arith.constant 0 : index
    %c0_0 = arith.constant 0 : index
    %0 = vector.load %arg3[%c0, %c0_0] : memref<8x128xf32, #tpu.memory_space<vmem>>, vector<8x128xf32>
    %c0_1 = arith.constant 0 : index
    %c0_2 = arith.constant 0 : index
    %1 = vector.load %arg1[%c0_1, %c0_2] : memref<128x96xf32, #tpu.memory_space<vmem>>, vector<128x96xf32>
    %cst = arith.constant dense<0.000000e+00> : vector<8x96xf32>
    %2 = tpu.matmul %0, %1, %cst {dimension_numbers = #tpu.dot_dimension_numbers<[1], [0], [0], [1], [0, 0, 1, 1], [], []>} : vector<8x128xf32>, vector<128x96xf32>, vector<8x96xf32> -> vector<8x96xf32>
    %c0_3 = arith.constant 0 : index
    %c0_4 = arith.constant 0 : index
    %3 = vector.load %arg2[%c0_3, %c0_4] : memref<1x96xf32, #tpu.memory_space<vmem>>, vector<1x96xf32>
    %4 = vector.broadcast %3 : vector<1x96xf32> to vector<8x96xf32>
    %5 = arith.addf %2, %4 : vector<8x96xf32>
    %c0_5 = arith.constant 0 : index
    %c0_6 = arith.constant 0 : index
    %6 = vector.load %arg4[%c0_5, %c0_6] : memref<8x96xf32, #tpu.memory_space<vmem>>, vector<8x96xf32>
    tpu.vector_store %arg4[%c0_5, %c0_6], %5 {strides = array<i32>} : memref<8x96xf32, #tpu.memory_space<vmem>>, vector<8x96xf32>,
    return
  }
  func.func @transform_0(%arg0: i32) -> (i32, i32) {
    %c0_i32 = arith.constant 0 : i32
    %c0_i32_0 = arith.constant 0 : i32
    %c0_i32_1 = arith.constant 0 : i32
    return %c0_i32, %c0_i32_0 : i32, i32
  }
  func.func @transform_1(%arg0: i32) -> (i32, i32) {
    %c0_i32 = arith.constant 0 : i32
    %c0_i32_0 = arith.constant 0 : i32
    %c0_i32_1 = arith.constant 0 : i32
    return %c0_i32, %c0_i32_0 : i32, i32
  }
  func.func @transform_2(%arg0: i32) -> (i32, i32) {
    %c0_i32 = arith.constant 0 : i32
    %c0_i32_0 = arith.constant 0 : i32
    return %arg0, %c0_i32 : i32, i32
  }
  func.func @transform_3(%arg0: i32) -> (i32, i32) {
    %c0_i32 = arith.constant 0 : i32
    %c0_i32_0 = arith.constant 0 : i32
    return %arg0, %c0_i32 : i32, i32
  }
}

</mosaic_0001>

<bundles_post_ra>
// kernel: tile.8
= control target key start
LH: loop header
LB: loop body
LE: loop exit
PB: predicated region body
PF: predicated region fallthrough
CT: control target
= control target key end

     0   :  { %s40_s0 = inlined_call_operand.vmem [shape: f32[3], index: 0, kind: input, shape index: {}]   ;;  %s41_s1 = inlined_call_operand.vmem [shape: f32[32,3], index: 1, kind: output, shape index: {}]  }
   0x1   :  { %v4_v0 = vld [vmem:[%s40_s0] ss:$0 sm:$0xff] }
   0x2   :  { %5 = vst [vmem:[%s41_s1] sm:$0xff] %v4_v0  ;;  %12 = vst [vmem:[%s41_s1 + $0x8] sm:$0xff] %v4_v0 }
   0x3   :  { %13 = vst [vmem:[%s41_s1 + $0x10] sm:$0xff] %v4_v0  ;;  %14 = vst [vmem:[%s41_s1 + $0x18] sm:$0xff] %v4_v0 }

// kernel: tile.9
= control target key start
LH: loop header
LB: loop body
LE: loop exit
PB: predicated region body
PF: predicated region fallthrough
CT: control target
= control target key end

     0   :  { %s259_s10 = smov 93   ;;  %s260_s11 = smov 87   ;;  %vm3_vm0 = vcmask 23552   ;;  %vm9_vm1 = vcmask 786152   ;;  %vm15_vm2 = vcmask 761552   ;;  %vm21_vm3 = vcmask 736952   ;;  %s399_s0 = inlined_call_operand.vmem [shape: f32[32,3], index: 0, kind: input, shape index: {}]   ;;  %s400_s1 = inlined_call_operand.vmem [shape: f32[1,96], index: 1, kind: output, shape index: {}]  }
   0x1   :  { %v197_v0 = vld [vmem:[%s399_s0 + $0x1f] sm:$0x1]   ;;  %v199_v1 = vld [vmem:[%s399_s0 + $0x1d] sm:$0x1]   ;;  %v198_v2 = vld [vmem:[%s399_s0 + $0x1e] sm:$0x1]  }
   0x2   :  { %7 = vrot.lane.b32.xlu0 %v197_v0, %s259_s10  ;;  %19 = vrot.lane.b32.xlu1 %v199_v1, %s260_s11  ;;  %v200_v3 = vld [vmem:[%s399_s0 + $0x1c] sm:$0x1]   ;;  %s261_s16 = smov 90   ;;  %s262_s17 = smov 84   ;;  %v201_v4 = vld [vmem:[%s399_s0 + $0x1b] sm:$0x1]  }
   0x3   :  { %v202_v5 = vld [vmem:[%s399_s0 + $0x1a] sm:$0x1]   ;;  %s263_s22 = smov 81   ;;  %s264_s23 = smov 78   ;;  %v203_v6 = vld [vmem:[%s399_s0 + $0x19] sm:$0x1]  }
   0x4   :  { %v204_v7 = vld [vmem:[%s399_s0 + $0x18] sm:$0x1]   ;;  %s265_s28 = smov 75   ;;  %s266_s29 = smov 72   ;;  %v205_v8 = vld [vmem:[%s399_s0 + $0x17] sm:$0x1]  }
   0x5   :  { %v206_v9 = vld [vmem:[%s399_s0 + $0x16] sm:$0x1]   ;;  %v2_v10 = vld [vmem:[%s399_s0] sm:$0x1]   ;;  %s267_s7 = smov 69   ;;  %s268_s8 = smov 66  }
   0x6   :  { %13 = vrot.lane.b32.xlu0 %v198_v2, %s261_s16  ;;  %25 = vrot.lane.b32.xlu1 %v200_v3, %s262_s17  ;;  %4 = vst.msk [vmem:[#allocation0] sm:$0x1] %vm3_vm0, %v2_v10   ;;  %v207_v11 = vld [vmem:[%s399_s0 + $0x15] sm:$0x1]   ;;  %v208_v12 = vld [vmem:[%s399_s0 + $0x14] sm:$0x1]  }
   0x7   :  { %s269_s13 = smov 63   ;;  %s270_s14 = smov 60   ;;  %v209_v13 = vld [vmem:[%s399_s0 + $0x13] sm:$0x1]   ;;  %v210_v14 = vld [vmem:[%s399_s0 + $0x12] sm:$0x1]  }
   0x8   :  { %s271_s19 = smov 57   ;;  %s272_s20 = smov 54   ;;  %v211_v15 = vld [vmem:[%s399_s0 + $0x11] sm:$0x1]   ;;  %v212_v16 = vld [vmem:[%s399_s0 + $0x10] sm:$0x1]  }
   0x9   :  { %s273_s25 = smov 51   ;;  %s274_s26 = smov 48   ;;  %v213_v17 = vld [vmem:[%s399_s0 + $0xf] sm:$0x1]   ;;  %v214_v18 = vld [vmem:[%s399_s0 + $0xe] sm:$0x1]  }
   0xa   :  { %31 = vrot.lane.b32.xlu0 %v201_v4, %s263_s22  ;;  %37 = vrot.lane.b32.xlu1 %v202_v5, %s264_s23  ;;  %s275_s2 = smov 45   ;;  %s276_s3 = smov 42   ;;  %v215_v19 = vld [vmem:[%s399_s0 + $0xd] sm:$0x1]   ;;  %v216_v20 = vld [vmem:[%s399_s0 + $0xc] sm:$0x1]  }
   0xb   :  { %s278_s9 = smov 36   ;;  %v217_v21 = vld [vmem:[%s399_s0 + $0xb] sm:$0x1]   ;;  %v218_v22 = vld [vmem:[%s399_s0 + $0xa] sm:$0x1]   ;;  %s280_s15 = smov 30  }
   0xc   :  { %v219_v23 = vld [vmem:[%s399_s0 + $0x9] sm:$0x1]   ;;  %v220_v24 = vld [vmem:[%s399_s0 + $0x8] sm:$0x1]   ;;  %s282_s21 = smov 24   ;;  %s284_s27 = smov 18  }
   0xd   :  { %v221_v25 = vld [vmem:[%s399_s0 + $0x7] sm:$0x1]   ;;  %v222_v26 = vld [vmem:[%s399_s0 + $0x6] sm:$0x1]   ;;  %v223_v27 = vld [vmem:[%s399_s0 + $0x5] sm:$0x1]  }
   0xe   :  { %43 = vrot.lane.b32.xlu0 %v203_v6, %s265_s28  ;;  %49 = vrot.lane.b32.xlu1 %v204_v7, %s266_s29  ;;  %v224_v28 = vld [vmem:[%s399_s0 + $0x4] sm:$0x1]   ;;  %s286_s4 = smov 12   ;;  %v225_v29 = vld [vmem:[%s399_s0 + $0x3] sm:$0x1]   ;;  %s288_s10 = smov 6  }
   0xf   :  { %v226_v30 = vld [vmem:[%s399_s0 + $0x2] sm:$0x1]   ;;  %v227_v31 = vld [vmem:[%s399_s0 + $0x1] sm:$0x1]   ;;  %s289_s0 = smov 3   ;;  %vm27_vm4 = vcmask 712352  }
  0x10   :  { %vm33_vm5 = vcmask 687752   ;;  %vm39_vm6 = vcmask 663152   ;;  %vm45_vm7 = vcmask 638552   ;;  %vm51_vm8 = vcmask 613952  }
  0x11   :  { %vm57_vm9 = vcmask 589352   ;;  %vm63_vm10 = vcmask 564752   ;;  %vm69_vm11 = vcmask 540152   ;;  %vm75_vm12 = vcmask 515552  }
  0x12   :  { %55 = vrot.lane.b32.xlu0 %v205_v8, %s267_s7  ;;  %61 = vrot.lane.b32.xlu1 %v206_v9, %s268_s8  ;;  %s277_s8 = smov 39   ;;  %vm81_vm13 = vcmask 490952   ;;  %vm87_vm14 = vcmask 466352   ;;  %vm93_vm15 = vcmask 441752   ;;  %vm99_vm0 = vcmask 417152  }
  0x16   :  { %67 = vrot.lane.b32.xlu0 %v207_v11, %s269_s13  ;;  %73 = vrot.lane.b32.xlu1 %v208_v12, %s270_s14  ;;  %s279_s14 = smov 33  }
  0x1a   :  { %79 = vrot.lane.b32.xlu0 %v209_v13, %s271_s19  ;;  %85 = vrot.lane.b32.xlu1 %v210_v14, %s272_s20  ;;  %s281_s20 = smov 27  }
  0x1e   :  { %91 = vrot.lane.b32.xlu0 %v211_v15, %s273_s25  ;;  %97 = vrot.lane.b32.xlu1 %v212_v16, %s274_s26  ;;  %s283_s26 = smov 21  }
  0x22   :  { %103 = vrot.lane.b32.xlu0 %v213_v17, %s275_s2  ;;  %109 = vrot.lane.b32.xlu1 %v214_v18, %s276_s3  ;;  %s285_s3 = smov 15  }
  0x26   :  { %115 = vrot.lane.b32.xlu0 %v215_v19, %s277_s8  ;;  %121 = vrot.lane.b32.xlu1 %v216_v20, %s278_s9  ;;  %s287_s9 = smov 9  }
  0x2a   :  { %127 = vrot.lane.b32.xlu0 %v217_v21, %s279_s14  ;;  %133 = vrot.lane.b32.xlu1 %v218_v22, %s280_s15 }
  0x2e   :  { %139 = vrot.lane.b32.xlu0 %v219_v23, %s281_s20  ;;  %145 = vrot.lane.b32.xlu1 %v220_v24, %s282_s21 }
  0x32   :  { %151 = vrot.lane.b32.xlu0 %v221_v25, %s283_s26  ;;  %157 = vrot.lane.b32.xlu1 %v222_v26, %s284_s27 }
  0x36   :  { %163 = vrot.lane.b32.xlu0 %v223_v27, %s285_s3  ;;  %169 = vrot.lane.b32.xlu1 %v224_v28, %s286_s4 }
  0x3a   :  { %175 = vrot.lane.b32.xlu0 %v225_v29, %s287_s9  ;;  %181 = vrot.lane.b32.xlu1 %v226_v30, %s288_s10 }
  0x3e   :  { %187 = vrot.lane.b32.xlu0 %v227_v31, %s289_s0 }
  0x74   :  { %v8_v32 = vpop.permute.xlu0 %7   ;;  %v20_v33 = vpop.permute.xlu1 %19  }
  0x75   :  { %10 = vst.msk [vmem:[#allocation0] sm:$0x1] %vm9_vm1, %v8_v32   ;;  %vm105_vm1 = vcmask 392552  }
  0x78   :  { %v14_v34 = vpop.permute.xlu0 %13   ;;  %v26_v35 = vpop.permute.xlu1 %25  }
  0x79   :  { %16 = vst.msk [vmem:[#allocation0] sm:$0x1] %vm15_vm2, %v14_v34   ;;  %vm111_vm2 = vcmask 367952  }
  0x7a   :  { %22 = vst.msk [vmem:[#allocation0] sm:$0x1] %vm21_vm3, %v20_v33   ;;  %vm117_vm3 = vcmask 343352  }
  0x7b   :  { %28 = vst.msk [vmem:[#allocation0] sm:$0x1] %vm27_vm4, %v26_v35   ;;  %vm123_vm4 = vcmask 318752  }
  0x7c   :  { %v32_v36 = vpop.permute.xlu0 %31   ;;  %v38_v37 = vpop.permute.xlu1 %37  }
  0x7d   :  { %34 = vst.msk [vmem:[#allocation0] sm:$0x1] %vm33_vm5, %v32_v36   ;;  %vm129_vm5 = vcmask 294152  }
  0x7e   :  { %40 = vst.msk [vmem:[#allocation0] sm:$0x1] %vm39_vm6, %v38_v37   ;;  %vm135_vm6 = vcmask 269552  }
  0x80   :  { %v44_v38 = vpop.permute.xlu0 %43   ;;  %v50_v39 = vpop.permute.xlu1 %49  }
  0x81   :  { %46 = vst.msk [vmem:[#allocation0] sm:$0x1] %vm45_vm7, %v44_v38   ;;  %vm141_vm7 = vcmask 244952  }
  0x82   :  { %52 = vst.msk [vmem:[#allocation0] sm:$0x1] %vm51_vm8, %v50_v39   ;;  %vm147_vm8 = vcmask 220352  }
  0x84   :  { %v56_v40 = vpop.permute.xlu0 %55   ;;  %v62_v41 = vpop.permute.xlu1 %61  }
  0x85   :  { %58 = vst.msk [vmem:[#allocation0] sm:$0x1] %vm57_vm9, %v56_v40   ;;  %vm153_vm9 = vcmask 195752  }
  0x86   :  { %64 = vst.msk [vmem:[#allocation0] sm:$0x1] %vm63_vm10, %v62_v41   ;;  %vm159_vm10 = vcmask 171152  }
  0x88   :  { %v68_v42 = vpop.permute.xlu0 %67   ;;  %v74_v43 = vpop.permute.xlu1 %73  }
  0x89   :  { %70 = vst.msk [vmem:[#allocation0] sm:$0x1] %vm69_vm11, %v68_v42   ;;  %vm165_vm11 = vcmask 146552  }
  0x8a   :  { %76 = vst.msk [vmem:[#allocation0] sm:$0x1] %vm75_vm12, %v74_v43   ;;  %vm171_vm12 = vcmask 121952  }
  0x8c   :  { %v80_v44 = vpop.permute.xlu0 %79   ;;  %v86_v45 = vpop.permute.xlu1 %85  }
  0x8d   :  { %82 = vst.msk [vmem:[#allocation0] sm:$0x1] %vm81_vm13, %v80_v44   ;;  %vm177_vm13 = vcmask 97352  }
  0x8e   :  { %88 = vst.msk [vmem:[#allocation0] sm:$0x1] %vm87_vm14, %v86_v45   ;;  %vm183_vm14 = vcmask 72752  }
  0x90   :  { %v92_v46 = vpop.permute.xlu0 %91   ;;  %v98_v47 = vpop.permute.xlu1 %97  }
  0x91   :  { %94 = vst.msk [vmem:[#allocation0] sm:$0x1] %vm93_vm15, %v92_v46   ;;  %vm189_vm15 = vcmask 48152  }
  0x92   :  { %100 = vst.msk [vmem:[#allocation0] sm:$0x1] %vm99_vm0, %v98_v47  }
  0x94   :  { %v104_v48 = vpop.permute.xlu0 %103   ;;  %v110_v49 = vpop.permute.xlu1 %109  }
  0x95   :  { %106 = vst.msk [vmem:[#allocation0] sm:$0x1] %vm105_vm1, %v104_v48  }
  0x96   :  { %112 = vst.msk [vmem:[#allocation0] sm:$0x1] %vm111_vm2, %v110_v49  }
  0x98   :  { %v116_v50 = vpop.permute.xlu0 %115   ;;  %v122_v51 = vpop.permute.xlu1 %121  }
  0x99   :  { %118 = vst.msk [vmem:[#allocation0] sm:$0x1] %vm117_vm3, %v116_v50  }
  0x9a   :  { %124 = vst.msk [vmem:[#allocation0] sm:$0x1] %vm123_vm4, %v122_v51  }
  0x9c   :  { %v128_v52 = vpop.permute.xlu0 %127   ;;  %v134_v53 = vpop.permute.xlu1 %133  }
  0x9d   :  { %130 = vst.msk [vmem:[#allocation0] sm:$0x1] %vm129_vm5, %v128_v52  }
  0x9e   :  { %136 = vst.msk [vmem:[#allocation0] sm:$0x1] %vm135_vm6, %v134_v53  }
  0xa0   :  { %v140_v54 = vpop.permute.xlu0 %139   ;;  %v146_v55 = vpop.permute.xlu1 %145  }
  0xa1   :  { %142 = vst.msk [vmem:[#allocation0] sm:$0x1] %vm141_vm7, %v140_v54  }
  0xa2   :  { %148 = vst.msk [vmem:[#allocation0] sm:$0x1] %vm147_vm8, %v146_v55  }
  0xa4   :  { %v152_v56 = vpop.permute.xlu0 %151   ;;  %v158_v57 = vpop.permute.xlu1 %157  }
  0xa5   :  { %154 = vst.msk [vmem:[#allocation0] sm:$0x1] %vm153_vm9, %v152_v56  }
  0xa6   :  { %160 = vst.msk [vmem:[#allocation0] sm:$0x1] %vm159_vm10, %v158_v57  }
  0xa8   :  { %v164_v58 = vpop.permute.xlu0 %163   ;;  %v170_v59 = vpop.permute.xlu1 %169  }
  0xa9   :  { %166 = vst.msk [vmem:[#allocation0] sm:$0x1] %vm165_vm11, %v164_v58  }
  0xaa   :  { %172 = vst.msk [vmem:[#allocation0] sm:$0x1] %vm171_vm12, %v170_v59  }
  0xac   :  { %v176_v60 = vpop.permute.xlu0 %175   ;;  %v182_v61 = vpop.permute.xlu1 %181  }
  0xad   :  { %178 = vst.msk [vmem:[#allocation0] sm:$0x1] %vm177_vm13, %v176_v60  }
  0xae   :  { %184 = vst.msk [vmem:[#allocation0] sm:$0x1] %vm183_vm14, %v182_v61  }
  0xb0   :  { %v188_v62 = vpop.permute.xlu0 %187  }
  0xb1   :  { %190 = vst.msk [vmem:[#allocation0] sm:$0x1] %vm189_vm15, %v188_v62  }
  0xb8   :  { %v194_v63 = vld [vmem:[#allocation0] sm:$0x1] }
  0xb9   :  { %196 = vst [vmem:[%s400_s1] sm:$0x1] %v194_v63 }

// kernel: ann_linear.1
= control target key start
LH: loop header
LB: loop body
LE: loop exit
PB: predicated region body
PF: predicated region fallthrough
CT: control target
= control target key end

     0   :  { %v194_v0 = vmov 0.0|0.0   ;;  %vm195_vm0 = vmmov 0   ;;  %v196_v4 = vmov 0.0   ;;  %vm108_vm1 = vcmask 785408   ;;  %s274_s0 = inlined_call_operand.vmem [shape: f32[128,96], index: 0, kind: input, shape index: {}]   ;;  %s275_s2 = inlined_call_operand.vmem [shape: f32[8,128], index: 2, kind: input, shape index: {}]   ;;  %s276_s1 = inlined_call_operand.vmem [shape: f32[1,96], index: 1, kind: input, shape index: {}]   ;;  %s277_s3 = inlined_call_operand.vmem [shape: f32[8,96], index: 3, kind: output, shape index: {}]  }
   0x1   :  { %167 = vmatprep.subr.bf16.mxu0 %v194_v0  ;;  %v15_v1 = vld [vmem:[%s274_s0] sm:$0xff]  ;;  %v16_v2 = vld [vmem:[%s274_s0 + $0x8] sm:$0xff]  ;;  %v17_v3 = vld [vmem:[%s274_s0 + $0x10] sm:$0xff]  ;;  %164 = vmatprep.mubr.msk.f32.mxu0 %vm195_vm0, %v196_v4 }
   0x2   :  { %v168_v5 = vpack.c.bf16 %v16_v2, %v15_v1  ;;  %v18_v6 = vld [vmem:[%s274_s0 + $0x18] sm:$0xff]  ;;  %v19_v8 = vld [vmem:[%s274_s0 + $0x20] sm:$0xff]  ;;  %v20_v9 = vld [vmem:[%s274_s0 + $0x28] sm:$0xff] }
   0x3   :  { %v171_v7 = vpack.c.bf16 %v18_v6, %v17_v3  ;;  %v174_v10 = vpack.c.bf16 %v20_v9, %v19_v8  ;;  %v21_v11 = vld [vmem:[%s274_s0 + $0x30] sm:$0xff]  ;;  %v22_v12 = vld [vmem:[%s274_s0 + $0x38] sm:$0xff]  ;;  %v23_v14 = vld [vmem:[%s274_s0 + $0x40] sm:$0xff] }
   0x4   :  { %169 = vmatpush3.bf16.msra.mxu0 %v168_v5  ;;  %v177_v13 = vpack.c.bf16 %v22_v12, %v21_v11  ;;  %v24_v15 = vld [vmem:[%s274_s0 + $0x48] sm:$0xff]  ;;  %v25_v17 = vld [vmem:[%s274_s0 + $0x50] sm:$0xff]  ;;  %v26_v18 = vld [vmem:[%s274_s0 + $0x58] sm:$0xff] }
   0x5   :  { %170 = vmatprep.subr.bf16.mxu0 %v194_v0  ;;  %v180_v16 = vpack.c.bf16 %v24_v15, %v23_v14  ;;  %v183_v19 = vpack.c.bf16 %v26_v18, %v25_v17  ;;  %v27_v20 = vld [vmem:[%s274_s0 + $0x60] sm:$0xff]  ;;  %v28_v21 = vld [vmem:[%s274_s0 + $0x68] sm:$0xff]  ;;  %v29_v23 = vld [vmem:[%s274_s0 + $0x70] sm:$0xff] }
   0x6   :  { %v186_v22 = vpack.c.bf16 %v28_v21, %v27_v20  ;;  %v30_v24 = vld [vmem:[%s274_s0 + $0x78] sm:$0xff]  ;;  %v14_v26 = vld [vmem:[%s275_s2] sm:$0xff] }
   0x7   :  { %v189_v25 = vpack.c.bf16 %v30_v24, %v29_v23  ;;  %v114_v27 = vld [vmem:[%s276_s1] ss:$0 sm:$0xff] }
   0x8   :  { %172 = vmatpush3.bf16.msra.mxu0 %v171_v7 }
   0x9   :  { %173 = vmatprep.subr.bf16.mxu0 %v194_v0 }
   0xc   :  { %175 = vmatpush3.bf16.msra.mxu0 %v174_v10 }
   0xd   :  { %176 = vmatprep.subr.bf16.mxu0 %v194_v0 }
  0x10   :  { %178 = vmatpush3.bf16.msra.mxu0 %v177_v13 }
  0x11   :  { %179 = vmatprep.subr.bf16.mxu0 %v194_v0 }
  0x14   :  { %181 = vmatpush3.bf16.msra.mxu0 %v180_v16 }
  0x15   :  { %182 = vmatprep.subr.bf16.mxu0 %v194_v0 }
  0x18   :  { %184 = vmatpush3.bf16.msra.mxu0 %v183_v19 }
  0x19   :  { %185 = vmatprep.subr.bf16.mxu0 %v194_v0 }
  0x1c   :  { %187 = vmatpush3.bf16.msra.mxu0 %v186_v22 }
  0x1d   :  { %188 = vmatprep.subr.bf16.mxu0 %v194_v0 }
  0x20   :  { %190 = vmatpush3.bf16.msra.mxu0 %v189_v25 }
  0x23   :  { %165 = vmatmul.mubr.f32.vlgmr.msra.gmra.mrb[0].mxu0 %v14_v26 }
  0xf6   :  { %v104_v28 = vpop.f32.mrb[0].mxu0 }
  0xf7   :  { %v105_v29 = vadd.f32 %v114_v27, %v104_v28  ;;  %v166_v30 = vpop.f32.mrb[1].mxu0 }
  0xf9   :  { %109 = vst.msk [vmem:[%s277_s3] sm:$0xff] %vm108_vm1, %v105_v29 }

</bundles_post_ra>
